<compile_context>
chip_gen: v7x
topology: tpu7x:2x2x1
jax: 0.10.0
libtpu: 0.0.40
codegen_flags: <defaults>
</compile_context>

<pallas_src>
import functools

import jax
import jax.numpy as jnp
from jax.experimental import pallas as pl
from jax.experimental.pallas import tpu as pltpu

NUM_CLASSES = 500


def _round_up(x, m):
    return (x + m - 1) // m * m


def _cdiv(a, b):
    return (a + b - 1) // b


def _bce_loss_kernel(pred_ref, targ_ref, out_ref, acc_ref, *,
                     num_classes, n_rows, tile_n, inner_tiles, mask_rows):
    """One grid step over a (tile_n, num_classes+1) logits tile.

    pred_ref: [tile_n, C+1] float (VMEM) logits tile (last col dropped via mask).
    targ_ref: [tile_n, 1]   int32 (VMEM) class indices in [0, num_classes].
    out_ref:  [1, 1]        f32   (SMEM) per-row-group partial sum.
    acc_ref:  [8, C+1]      f32   (VMEM scratch) small carried accumulator.
    """
    o = pl.program_id(0)   # row-group axis ("parallel": split across TCs on v7x)
    i = pl.program_id(1)   # inner tile axis ("arbitrary": carries the accumulator)

    @pl.when(i == 0)
    def _init():
        acc_ref[...] = jnp.zeros_like(acc_ref)

    x = pred_ref[...].astype(jnp.float32)          # compute always in f32
    tn, c_tot = x.shape

    col = jax.lax.broadcasted_iota(jnp.int32, (tn, c_tot), 1)
    col_ok = col < num_classes                     # zero the dropped last column

    # x * onehot(targ) without materializing the one-hot:
    xt = jnp.where(targ_ref[...] == col, x, 0.0)
    # Numerically stable BCE-with-logits (matches PyTorch):
    #   max(x, 0) - x*t + log1p(exp(-|x|))
    # TODO(synk): optional bf16 softplus on the EUP for v6e/v7x (~2x EUP
    # throughput, ~1e-3 relative drift); kept in f32 here for tight accuracy.
    bce = jnp.maximum(x, 0.0) - xt + jnp.log1p(jnp.exp(-jnp.abs(x)))

    def _accumulate(tile):
        # Row-reduce the (tile_n, C+1) tile into the tiny (8, C+1) accumulator:
        # no full-tile accumulator load/store per step, tiny epilogue reduce.
        acc_ref[...] += tile.reshape(tn // 8, 8, c_tot).sum(axis=0)

    if mask_rows:
        # Only blocks at/past the true row boundary need the row-validity mask;
        # keep the iota/compare/select off the hot path of every other block.
        row_start = (o * inner_tiles + i) * tile_n
        block_is_full = row_start + tile_n <= n_rows

        @pl.when(block_is_full)
        def _hot():
            _accumulate(jnp.where(col_ok, bce, 0.0))

        @pl.when(jnp.logical_not(block_is_full))
        def _edge():
            row = jax.lax.broadcasted_iota(jnp.int32, (tn, c_tot), 0) + row_start
            _accumulate(jnp.where(col_ok & (row < n_rows), bce, 0.0))
    else:
        _accumulate(jnp.where(col_ok, bce, 0.0))

    @pl.when(i == pl.num_programs(1) - 1)
    def _store():
        out_ref[0, 0] = jnp.sum(acc_ref[...])


def bce_loss(pred, targ, num_classes=NUM_CLASSES, max_tile_n=2048,
             num_core_splits=2):
    """pred: [N, num_classes + 1] float, targ: [N] int -> scalar float32."""
    n, c_tot = pred.shape
    assert c_tot == num_classes + 1, (c_tot, num_classes)
    n_rows = n                                # true (unpadded) row count
    targ2d = targ.astype(jnp.int32)[:, None]

    # --- static tiling / core-split decisions -----------------------------
    n8 = _round_up(n, 8)
    tile_n = min(_round_up(max_tile_n, 8), n8)
    total_tiles = _cdiv(n8, tile_n)
    num_splits = num_core_splits if total_tiles >= num_core_splits else 1
    inner_tiles = _cdiv(total_tiles, num_splits)
    n_padded = num_splits * inner_tiles * tile_n

    if n_padded != n:
        # Zero-padded rows are masked out in-kernel (select, not multiply).
        pred = jnp.pad(pred, ((0, n_padded - n), (0, 0)))
        targ2d = jnp.pad(targ2d, ((0, n_padded - n), (0, 0)))
    mask_rows = n_padded != n_rows

    kernel = functools.partial(
        _bce_loss_kernel, num_classes=num_classes, n_rows=n_rows,
        tile_n=tile_n, inner_tiles=inner_tiles, mask_rows=mask_rows)

    itemsize = jnp.dtype(pred.dtype).itemsize
    partials = pl.pallas_call(
        kernel,
        out_shape=jax.ShapeDtypeStruct((num_splits, 1), jnp.float32),
        grid=(num_splits, inner_tiles),
        in_specs=[
            # Full logits tile; dropped last column is masked in-kernel.
            pl.BlockSpec((tile_n, c_tot), lambda o, i: (o * inner_tiles + i, 0)),
            # Target class indices.
            pl.BlockSpec((tile_n, 1), lambda o, i: (o * inner_tiles + i, 0)),
        ],
        out_specs=pl.BlockSpec((1, 1), lambda o, i: (o, 0),
                               memory_space=pltpu.SMEM),
        scratch_shapes=[pltpu.VMEM((8, c_tot), jnp.float32)],
        compiler_params=pltpu.CompilerParams(
            # Row-group axis can be sharded across TCs (v7x); the inner axis
            # carries the accumulator and must stay sequential.
            dimension_semantics=("parallel", "arbitrary"),
            vmem_limit_bytes=32 * 1024 * 1024),
        cost_estimate=pl.CostEstimate(
            flops=6 * n_padded * num_classes,
            transcendentals=2 * n_padded * num_classes,
            bytes_accessed=n_padded * c_tot * itemsize + n_padded * 4
                           + num_splits * 4),
    )(pred, targ2d)
    return jnp.sum(partials) * (1.0 / num_classes)


def _reference_bce_loss(pred, targ, num_classes=NUM_CLASSES):
    """Pure-JAX reference mirroring the PyTorch module."""
    t = jax.nn.one_hot(targ, num_classes + 1, dtype=jnp.float32)[:, :-1]
    x = pred[:, :-1].astype(jnp.float32)
    bce = jnp.maximum(x, 0.0) - x * t + jnp.log1p(jnp.exp(-jnp.abs(x)))
    return jnp.sum(bce) / num_classes


if __name__ == "__main__":
    key = jax.random.PRNGKey(0)
    k1, k2, k3, k4 = jax.random.split(key, 4)

    # Small, module-consistent shapes: pred [batch, num_classes + 1], targ [batch].
    batch = 16
    pred = jax.random.normal(k1, (batch, NUM_CLASSES + 1), dtype=jnp.float32)
    # Labels in [0, NUM_CLASSES]; NUM_CLASSES == "no class" (all-zero target row).
    targ = jax.random.randint(k2, (batch,), 0, NUM_CLASSES + 1)
    loss = jax.block_until_ready(bce_loss(pred, targ))
    ref = jax.block_until_ready(_reference_bce_loss(pred, targ))
    assert jnp.allclose(loss, ref, rtol=1e-5, atol=1e-5), (loss, ref)

    # Second check: exercises the dual-split grid (2, 3), the partially valid
    # edge block and a fully padded trailing block (N=1030 padded to 1536).
    batch2 = 1030
    pred2 = jax.random.normal(k3, (batch2, NUM_CLASSES + 1), dtype=jnp.float32)
    targ2 = jax.random.randint(k4, (batch2,), 0, NUM_CLASSES + 1)
    loss2 = jax.block_until_ready(bce_loss(pred2, targ2, max_tile_n=256))
    ref2 = jax.block_until_ready(_reference_bce_loss(pred2, targ2))
    assert jnp.allclose(loss2, ref2, rtol=5e-4, atol=1e-3), (loss2, ref2)

    print("KERNEL_OK")
</pallas_src>

<mosaic_0001>
module attributes {stable_mosaic.version = 11 : i64} {
  func.func @_bce_loss_kernel(%arg0: i32, %arg1: i32, %arg2: memref<16x501xf32, #tpu.memory_space<vmem>>, %arg3: memref<16x1xi32, #tpu.memory_space<vmem>>, %arg4: memref<1x1xf32, #tpu.memory_space<smem>>, %arg5: memref<8x501xf32, #tpu.memory_space<vmem>>) attributes {dimension_semantics = [#tpu.dimension_semantics<parallel>, #tpu.dimension_semantics<arbitrary>], iteration_bounds = array<i64: 1, 1>, scalar_prefetch = 0 : i64, scratch_operands = 1 : i64, tpu.core_type = #tpu.core_type<tc>, window_params = [{transform_indices = @transform_0, window_bounds = array<i64: 16, 501>}, {transform_indices = @transform_1, window_bounds = array<i64: 16, 1>}, {transform_indices = @transform_2, window_bounds = array<i64: 1, 1>}]} {
    %c0_i32 = arith.constant 0 : i32
    %0 = arith.cmpi eq, %arg1, %c0_i32 : i32
    %1 = arith.extui %0 : i1 to i32
    %c0_i32_0 = arith.constant 0 : i32
    %2 = arith.cmpi ne, %1, %c0_i32_0 : i32
    scf.if %2 {
      %cst_14 = arith.constant 0.000000e+00 : f32
      %31 = vector.broadcast %cst_14 : f32 to vector<8x501xf32>
      %c0_15 = arith.constant 0 : index
      %c0_16 = arith.constant 0 : index
      %32 = vector.load %arg5[%c0_15, %c0_16] : memref<8x501xf32, #tpu.memory_space<vmem>>, vector<8x501xf32>
      tpu.vector_store %arg5[%c0_15, %c0_16], %31 {strides = array<i32>} : memref<8x501xf32, #tpu.memory_space<vmem>>, vector<8x501xf32>,
    } else {
    }
    %c0 = arith.constant 0 : index
    %c0_1 = arith.constant 0 : index
    %3 = vector.load %arg2[%c0, %c0_1] : memref<16x501xf32, #tpu.memory_space<vmem>>, vector<16x501xf32>
    %4 = tpu.iota {dimensions = array<i32: 1>} : vector<16x501xi32>
    %c500_i32 = arith.constant 500 : i32
    %5 = vector.broadcast %c500_i32 : i32 to vector<16x501xi32>
    %6 = arith.cmpi slt, %4, %5 : vector<16x501xi32>
    %c0_2 = arith.constant 0 : index
    %c0_3 = arith.constant 0 : index
    %7 = vector.load %arg3[%c0_2, %c0_3] : memref<16x1xi32, #tpu.memory_space<vmem>>, vector<16x1xi32>
    %8 = vector.broadcast %7 : vector<16x1xi32> to vector<16x501xi32>
    %9 = arith.cmpi eq, %8, %4 : vector<16x501xi32>
    %cst = arith.constant 0.000000e+00 : f32
    %10 = vector.broadcast %cst : f32 to vector<16x501xf32>
    %11 = arith.select %9, %3, %10 : vector<16x501xi1>, vector<16x501xf32>
    %cst_4 = arith.constant 0.000000e+00 : f32
    %12 = vector.broadcast %cst_4 : f32 to vector<16x501xf32>
    %13 = arith.maximumf %3, %12 : vector<16x501xf32>
    %14 = arith.subf %13, %11 : vector<16x501xf32>
    %15 = math.absf %3 : vector<16x501xf32>
    %cst_5 = arith.constant 0.000000e+00 : f32
    %16 = vector.broadcast %cst_5 : f32 to vector<16x501xf32>
    %17 = arith.subf %16, %15 : vector<16x501xf32>
    %18 = math.exp %17 : vector<16x501xf32>
    %19 = math.log1p %18 : vector<16x501xf32>
    %20 = arith.addf %14, %19 : vector<16x501xf32>
    %cst_6 = arith.constant 0.000000e+00 : f32
    %21 = vector.broadcast %cst_6 : f32 to vector<16x501xf32>
    %22 = arith.select %6, %20, %21 : vector<16x501xi1>, vector<16x501xf32>
    %c0_7 = arith.constant 0 : index
    %c0_8 = arith.constant 0 : index
    %23 = vector.load %arg5[%c0_7, %c0_8] : memref<8x501xf32, #tpu.memory_space<vmem>>, vector<8x501xf32>
    %24 = vector.shape_cast %22 : vector<16x501xf32> to vector<2x8x501xf32>
    %cst_9 = arith.constant dense<0.000000e+00> : vector<8x501xf32>
    %25 = vector.multi_reduction <add>, %24, %cst_9 [0] : vector<2x8x501xf32> to vector<8x501xf32>
    %26 = arith.addf %23, %25 : vector<8x501xf32>
    %c0_10 = arith.constant 0 : index
    %c0_11 = arith.constant 0 : index
    %27 = vector.load %arg5[%c0_10, %c0_11] : memref<8x501xf32, #tpu.memory_space<vmem>>, vector<8x501xf32>
    tpu.vector_store %arg5[%c0_10, %c0_11], %26 {strides = array<i32>} : memref<8x501xf32, #tpu.memory_space<vmem>>, vector<8x501xf32>,
    %c0_i32_12 = arith.constant 0 : i32
    %28 = arith.cmpi eq, %arg1, %c0_i32_12 : i32
    %29 = arith.extui %28 : i1 to i32
    %c0_i32_13 = arith.constant 0 : i32
    %30 = arith.cmpi ne, %29, %c0_i32_13 : i32
    scf.if %30 {
      %c0_14 = arith.constant 0 : index
      %c0_15 = arith.constant 0 : index
      %31 = vector.load %arg5[%c0_14, %c0_15] : memref<8x501xf32, #tpu.memory_space<vmem>>, vector<8x501xf32>
      %32 = vector.shape_cast %31 : vector<8x501xf32> to vector<1x8x501xf32>
      %cst_16 = arith.constant dense<0.000000e+00> : vector<1xf32>
      %33 = vector.multi_reduction <add>, %32, %cst_16 [1, 2] : vector<1x8x501xf32> to vector<1xf32>
      %34 = vector.shape_cast %33 : vector<1xf32> to vector<1x1x1xf32>
      %35 = vector.extract %34[0, 0, 0] : f32 from vector<1x1x1xf32>
      %c0_17 = arith.constant 0 : index
      %c0_18 = arith.constant 0 : index
      %36 = memref.load %arg4[%c0_17, %c0_18] : memref<1x1xf32, #tpu.memory_space<smem>>
      memref.store %35, %arg4[%c0_17, %c0_18] : memref<1x1xf32, #tpu.memory_space<smem>>
    } else {
    }
    return
  }
  func.func @transform_0(%arg0: i32, %arg1: i32) -> (i32, i32) {
    %c1_i32 = arith.constant 1 : i32
    %0 = arith.muli %arg0, %c1_i32 : i32
    %1 = arith.addi %0, %arg1 : i32
    %c0_i32 = arith.constant 0 : i32
    %c0_i32_0 = arith.constant 0 : i32
    return %1, %c0_i32 : i32, i32
  }
  func.func @transform_1(%arg0: i32, %arg1: i32) -> (i32, i32) {
    %c1_i32 = arith.constant 1 : i32
    %0 = arith.muli %arg0, %c1_i32 : i32
    %1 = arith.addi %0, %arg1 : i32
    %c0_i32 = arith.constant 0 : i32
    %c0_i32_0 = arith.constant 0 : i32
    return %1, %c0_i32 : i32, i32
  }
  func.func @transform_2(%arg0: i32, %arg1: i32) -> (i32, i32) {
    %c0_i32 = arith.constant 0 : i32
    %c0_i32_0 = arith.constant 0 : i32
    return %arg0, %c0_i32 : i32, i32
  }
}

</mosaic_0001>

<bundles_post_ra>
// kernel: tpu_custom_call.1
= control target key start
LH: loop header
LB: loop body
LE: loop exit
PB: predicated region body
PF: predicated region fallthrough
CT: control target
= control target key end

     0   :  { %7 = vsyncpa [#allocation4], 0  ;;  %s617_s0 = inlined_call_operand.hbm [shape: f32[16,501], index: 0, kind: input, shape index: {}]   ;;  %s618_s1 = inlined_call_operand.vmem [shape: s32[16,1], index: 1, kind: input, shape index: {}]   ;;  %s619_s2 = inlined_call_operand.hbm [shape: f32[1,1], index: 2, kind: output, shape index: {}]  }
   0x1   :  { %8 = vsyncpa [#allocation5], 0  ;;  %s379_s9 = smov [#allocation3]   ;;  %s343_s13 = scalar_lea.hbm %s617_s0, 1024 }
   0x2   :  { %s19_s10 = sshll.u32 %s379_s9, 4  ;;  %p344_p0 = scmp.ne.s32.totalorder %s617_s0, %s343_s13  ;;  %s20_s10 = int_to_ptr.vmem [resolvable:$true] %s19_s10 }
   0x3   :  { %p347_p1 = scmp.lt.u32.totalorder %s343_s13, %s617_s0 }
   0x5   :  { %p349_p2 = pnand %p347_p1, %p344_p0 }
   0x7   :  { %352 = shalt.err (!%p349_p2)
}
   0x8   :  { %s353_s18 = scalar_lea.vmem %s20_s10, 1024  ;;  %p358_p4 = scmp.lt.s32.totalorder %s20_s10, %s20_s10 }
   0x9   :  { %p354_p3 = scmp.ne.s32.totalorder %s20_s10, %s353_s18  ;;  %p359_p5 = scmp.lt.s32.totalorder %s353_s18, %s353_s18 }
   0xb   :  { %p360_p6 = por %p359_p5, %p358_p4 }
   0xd   :  { %p361_p7 = pnand %p360_p6, %p354_p3 }
   0xf   :  { %364 = shalt.err (!%p361_p7)
}
  0x10   :  { %s380_s19 = smov 512   ;;  %s381_s20 = smov 32  }
  0x11   :  { %25 = dma.hbm_to_vmem [thread:$0]  %s617_s0, 1024, %s20_s10, [#allocation4], %s380_s19, %s380_s19, %s381_s20  }
  0x12   :  { %375 = dma.done.wait [#allocation4], 1024  }
  0x13   :  { %376 = vsyncadd [#allocation4], 4294966272  ;;  %v382_v0 = vmov 0   ;;  %v81_v1 = vld [vmem:[%s618_s1] sm:$0xff]  ;;  %v82_v2 = vld [vmem:[%s618_s1 + $0x8] sm:$0xff]  ;;  %vm62_vm0 = vcmask 957440   ;;  %v72_v40 = vlaneseq }
  0x14   :  { %310 = vset.pattern.permute.xlu0 %v382_v0  ;;  %v383_v3 = vmov 0.0   ;;  %v419_v4 = vld [vmem:[#allocation3] sm:$0xff]  ;;  %v421_v5 = vld [vmem:[#allocation3 + $0x18] sm:$0xff]  ;;  %v423_v6 = vld [vmem:[#allocation3 + $0x8] sm:$0xff]  ;;  %s365_s28 = scalar_lea.hbm %s619_s2, 16 }
  0x15   :  { %84 = vperm.xlu0 %310, %v81_v1   ;;  %63 = vst.msk [vmem:[#allocation2 + $0x18] sm:$0xff] %vm62_vm0, %v383_v3  ;;  %v121_v7 = vand.u32 2147483647, %v419_v4  ;;  %v426_v8 = vld [vmem:[#allocation3 + $0x10] sm:$0xff]  ;;  %v124_v9 = vand.u32 2147483647, %v421_v5  ;;  %p366_p8 = scmp.ne.s32.totalorder %s619_s2, %s365_s28  ;;  %p369_p9 = scmp.lt.u32.totalorder %s365_s28, %s619_s2 }
  0x16   :  { %v429_v10 = vld [vmem:[#allocation3 + $0x20] sm:$0xff]  ;;  %v431_v11 = vld [vmem:[#allocation3 + $0x28] sm:$0xff]  ;;  %v122_v12 = vand.u32 2147483647, %v423_v6  ;;  %v434_v13 = vld [vmem:[#allocation3 + $0x30] sm:$0xff]  ;;  %v463_v49 = vand.u32 127, %v72_v40 }
  0x17   :  { %v123_v14 = vand.u32 2147483647, %v426_v8  ;;  %v129_v15 = vsub.f32 0.0, %v121_v7  ;;  %v437_v16 = vld [vmem:[#allocation3 + $0x38] sm:$0xff]  ;;  %v125_v17 = vand.u32 2147483647, %v429_v10  ;;  %p371_p10 = pnand %p369_p9, %p366_p8 }
  0x18   :  { %v132_v18 = vsub.f32 0.0, %v124_v9  ;;  %v126_v19 = vand.u32 2147483647, %v431_v11  ;;  %v127_v20 = vand.u32 2147483647, %v434_v13  ;;  %v130_v21 = vsub.f32 0.0, %v122_v12 }
  0x19   :  { %87 = vperm.xlu0 %310, %v82_v2   ;;  %v128_v22 = vand.u32 2147483647, %v437_v16  ;;  %v131_v23 = vsub.f32 0.0, %v123_v14  ;;  %v137_v24 = vmul.f32 1.442695, %v129_v15  ;;  %v133_v25 = vsub.f32 0.0, %v125_v17 }
  0x1a   :  { %v143_v26 = vmul.f32 1.442695, %v132_v18  ;;  %v134_v27 = vsub.f32 0.0, %v126_v19  ;;  %v135_v28 = vsub.f32 0.0, %v127_v20  ;;  %v139_v29 = vmul.f32 1.442695, %v130_v21 }
  0x1b   :  { %v136_v30 = vsub.f32 0.0, %v128_v22  ;;  %v141_v31 = vmul.f32 1.442695, %v131_v23  ;;  %311 = vpow2.f32 %v137_v24  ;;  %v145_v32 = vmul.f32 1.442695, %v133_v25 }
  0x1c   :  { %313 = vpow2.f32 %v143_v26  ;;  %v147_v33 = vmul.f32 1.442695, %v134_v27  ;;  %v149_v34 = vmul.f32 1.442695, %v135_v28  ;;  %v470_v54 = vadd.s32 384, %v463_v49 }
  0x1d   :  { %315 = vpow2.f32 %v139_v29  ;;  %v151_v35 = vmul.f32 1.442695, %v136_v30  ;;  %v473_v55 = vadd.s32 128, %v463_v49  ;;  %v105_v56 = vmax.f32 %v419_v4, 0.0 }
  0x1e   :  { %317 = vpow2.f32 %v141_v31  ;;  %v108_v57 = vmax.f32 %v421_v5, 0.0  ;;  %v478_v58 = vadd.s32 256, %v463_v49  ;;  %v106_v63 = vmax.f32 %v423_v6, 0.0 }
  0x1f   :  { %319 = vpow2.f32 %v145_v32  ;;  %v107_v0 = vmax.f32 %v426_v8, 0.0  ;;  %v109_v1 = vmax.f32 %v429_v10, 0.0  ;;  %v110_v2 = vmax.f32 %v431_v11, 0.0 }
  0x20   :  { %321 = vpow2.f32 %v147_v33  ;;  %v111_v9 = vmax.f32 %v434_v13, 0.0  ;;  %v112_v12 = vmax.f32 %v437_v16, 0.0  ;;  %vm80_vm9 = vcmp.lt.s32.totalorder %v470_v54, 500 }
  0x21   :  { %323 = vpow2.f32 %v149_v34 }
  0x22   :  { %325 = vpow2.f32 %v151_v35 }
  0x25   :  { %v443_v36 = vpop.eup %311 }
  0x26   :  { %v445_v37 = vpop.eup %313  ;;  %v153_v41 = vadd.f32 1.0, %v443_v36  ;;  %v156_v59 = vmul.f32 -0.5, %v443_v36  ;;  %v159_v60 = vand.u32 2147483647, %v443_v36 }
  0x27   :  { %v447_v38 = vpop.eup %315  ;;  %v180_v43 = vadd.f32 1.0, %v445_v37  ;;  %v183_v61 = vmul.f32 -0.5, %v445_v37  ;;  %v186_v62 = vand.u32 2147483647, %v445_v37 }
  0x28   :  { %v449_v39 = vpop.eup %317  ;;  %v162_v45 = vadd.f32 1.0, %v447_v38  ;;  %327 = vlog2.f32 %v153_v41  ;;  %v165_v3 = vmul.f32 -0.5, %v447_v38  ;;  %v157_v18 = vadd.f32 1.0, %v156_v59 }
  0x29   :  { %v452_v42 = vpop.eup %319  ;;  %v171_v47 = vadd.f32 1.0, %v449_v39  ;;  %329 = vlog2.f32 %v180_v43  ;;  %v174_v7 = vmul.f32 -0.5, %v449_v39  ;;  %vm494_vm1 = vcmp.lt.f32.partialorder %v159_v60, 0.0004427343 }
  0x2a   :  { %v455_v44 = vpop.eup %321  ;;  %v189_v50 = vadd.f32 1.0, %v452_v42  ;;  %331 = vlog2.f32 %v162_v45  ;;  %v192_v14 = vmul.f32 -0.5, %v452_v42  ;;  %v184_v20 = vadd.f32 1.0, %v183_v61 }
  0x2b   :  { %v458_v46 = vpop.eup %323  ;;  %v198_v51 = vadd.f32 1.0, %v455_v44  ;;  %333 = vlog2.f32 %v171_v47  ;;  %v201_v15 = vmul.f32 -0.5, %v455_v44  ;;  %vm499_vm2 = vcmp.lt.f32.partialorder %v186_v62, 0.0004427343 }
  0x2c   :  { %v461_v48 = vpop.eup %325  ;;  %v207_v52 = vadd.f32 1.0, %v458_v46  ;;  %335 = vlog2.f32 %v189_v50  ;;  %v210_v21 = vmul.f32 -0.5, %v458_v46  ;;  %v168_v24 = vand.u32 2147483647, %v447_v38 }
  0x2d   :  { %v216_v53 = vadd.f32 1.0, %v461_v48  ;;  %337 = vlog2.f32 %v198_v51  ;;  %v177_v25 = vand.u32 2147483647, %v449_v39  ;;  %v166_v27 = vadd.f32 1.0, %v165_v3 }
  0x2e   :  { %339 = vlog2.f32 %v207_v52  ;;  %v175_v28 = vadd.f32 1.0, %v174_v7  ;;  %v195_v29 = vand.u32 2147483647, %v452_v42  ;;  %v219_v30 = vmul.f32 -0.5, %v461_v48 }
  0x2f   :  { %341 = vlog2.f32 %v216_v53  ;;  %v193_v32 = vadd.f32 1.0, %v192_v14  ;;  %v202_v33 = vadd.f32 1.0, %v201_v15  ;;  %v204_v34 = vand.u32 2147483647, %v455_v44 }
  0x30   :  { %v213_v35 = vand.u32 2147483647, %v458_v46  ;;  %v512_v43 = vmul.f32 %v443_v36, %v157_v18  ;;  %v211_v45 = vadd.f32 1.0, %v210_v21  ;;  %v222_v47 = vand.u32 2147483647, %v461_v48 }
  0x31   :  { %v185_v52 = vmul.f32 %v445_v37, %v184_v20  ;;  %vm516_vm3 = vcmp.lt.f32.partialorder %v168_v24, 0.0004427343  ;;  %vm520_vm4 = vcmp.lt.f32.partialorder %v177_v25, 0.0004427343  ;;  %v167_v36 = vmul.f32 %v447_v38, %v166_v27 }
  0x32   :  { %v328_v17 = vpop.eup %327  ;;  %v176_v62 = vmul.f32 %v449_v39, %v175_v28  ;;  %v220_v3 = vadd.f32 1.0, %v219_v30  ;;  %v194_v14 = vmul.f32 %v452_v42, %v193_v32  ;;  %vm527_vm5 = vcmp.lt.f32.partialorder %v195_v29, 0.0004427343 }
  0x33   :  { %v330_v22 = vpop.eup %329  ;;  %v509_v41 = vmul.f32 0.6931472, %v328_v17  ;;  %v203_v15 = vmul.f32 %v455_v44, %v202_v33  ;;  %vm532_vm6 = vcmp.lt.f32.partialorder %v204_v34, 0.0004427343  ;;  %v212_v39 = vmul.f32 %v458_v46, %v211_v45 }
  0x34   :  { %v332_v26 = vpop.eup %331  ;;  %v182_v51 = vmul.f32 0.6931472, %v330_v22  ;;  %vm541_vm7 = vcmp.lt.f32.partialorder %v213_v35, 0.0004427343  ;;  %vm545_vm8 = vcmp.lt.f32.partialorder %v222_v47, 0.0004427343 }
  0x35   :  { %v334_v31 = vpop.eup %333  ;;  %v164_v61 = vmul.f32 0.6931472, %v332_v26  ;;  %v161_v38 = vsel %vm494_vm1, %v512_v43, %v509_v41  ;;  %v221_v26 = vmul.f32 %v461_v48, %v220_v3 }
  0x36   :  { %v336_v40 = vpop.eup %335  ;;  %v188_v44 = vsel %vm499_vm2, %v185_v52, %v182_v51  ;;  %v173_v20 = vmul.f32 0.6931472, %v334_v31 }
  0x37   :  { %v338_v50 = vpop.eup %337  ;;  %v191_v21 = vmul.f32 0.6931472, %v336_v40  ;;  %v170_v46 = vsel %vm516_vm3, %v167_v36, %v164_v61 }
  0x38   :  { %v340_v60 = vpop.eup %339  ;;  %v200_v22 = vmul.f32 0.6931472, %v338_v50  ;;  %v179_v48 = vsel %vm520_vm4, %v176_v62, %v173_v20 }
  0x39   :  { %v342_v7 = vpop.eup %341  ;;  %v209_v24 = vmul.f32 0.6931472, %v340_v60  ;;  %v197_v31 = vsel %vm527_vm5, %v194_v14, %v191_v21 }
  0x3a   :  { %v218_v25 = vmul.f32 0.6931472, %v342_v7  ;;  %v206_v32 = vsel %vm532_vm6, %v203_v15, %v200_v22 }
  0x94   :  { %v85_v19 = vpop.permute.xlu0 %84 }
  0x95   :  { %vm89_vm10 = vcmp.eq.s32.totalorder %v85_v19, %v463_v49  ;;  %vm92_vm11 = vcmp.eq.s32.totalorder %v85_v19, %v470_v54  ;;  %vm90_vm12 = vcmp.eq.s32.totalorder %v85_v19, %v473_v55  ;;  %vm91_vm13 = vcmp.eq.s32.totalorder %v85_v19, %v478_v58 }
  0x96   :  { %v97_v23 = vsel %vm89_vm10, %v419_v4, 0.0  ;;  %v100_v27 = vsel %vm92_vm11, %v421_v5, 0.0  ;;  %v98_v28 = vsel %vm90_vm12, %v423_v6, 0.0  ;;  %v99_v29 = vsel %vm91_vm13, %v426_v8, 0.0 }
  0x97   :  { %v116_v30 = vsub.f32 %v108_v57, %v100_v27  ;;  %v113_v33 = vsub.f32 %v105_v56, %v97_v23  ;;  %v114_v35 = vsub.f32 %v106_v63, %v98_v28  ;;  %v215_v5 = vsel %vm541_vm7, %v212_v39, %v209_v24 }
  0x98   :  { %v88_v34 = vpop.permute.xlu0 %87  ;;  %v224_v57 = vsel %vm545_vm8, %v221_v26, %v218_v25  ;;  %v115_v41 = vsub.f32 %v107_v0, %v99_v29 }
  0x99   :  { %v228_v40 = vadd.f32 %v188_v44, %v116_v30  ;;  %vm93_vm14 = vcmp.eq.s32.totalorder %v88_v34, %v463_v49  ;;  %vm94_vm15 = vcmp.eq.s32.totalorder %v88_v34, %v473_v55  ;;  %vm95_vm1 = vcmp.eq.s32.totalorder %v88_v34, %v478_v58 }
  0x9a   :  { %vm96_vm2 = vcmp.eq.s32.totalorder %v88_v34, %v470_v54  ;;  %v101_v4 = vsel %vm93_vm14, %v429_v10, 0.0  ;;  %v102_v6 = vsel %vm94_vm15, %v431_v11, 0.0  ;;  %v103_v56 = vsel %vm95_vm1, %v434_v13, 0.0 }
  0x9b   :  { %v104_v63 = vsel %vm96_vm2, %v437_v16, 0.0  ;;  %v117_v49 = vsub.f32 %v109_v1, %v101_v4  ;;  %v118_v55 = vsub.f32 %v110_v2, %v102_v6  ;;  %v119_v8 = vsub.f32 %v111_v9, %v103_v56  ;;  %v244_v2 = vld [vmem:[#allocation2 + $0x18] sm:$0xff] }
  0x9c   :  { %v120_v58 = vsub.f32 %v112_v12, %v104_v63  ;;  %v225_v0 = vadd.f32 %v161_v38, %v113_v33  ;;  %v226_v43 = vadd.f32 %v170_v46, %v114_v35  ;;  %v227_v50 = vadd.f32 %v179_v48, %v115_v41 }
  0x9d   :  { %v229_v45 = vadd.f32 %v197_v31, %v117_v49  ;;  %v230_v47 = vadd.f32 %v206_v32, %v118_v55  ;;  %v231_v51 = vadd.f32 %v215_v5, %v119_v8  ;;  %v236_v10 = vsel %vm80_vm9, %v228_v40, 0.0 }
  0x9e   :  { %v232_v52 = vadd.f32 %v224_v57, %v120_v58  ;;  %v249_v16 = vsel %vm62_vm0, %v236_v10, 0.0 }
  0x9f   :  { %v245_v1 = vadd.f32 %v229_v45, %v225_v0  ;;  %v246_v53 = vadd.f32 %v230_v47, %v226_v43  ;;  %v247_v13 = vadd.f32 %v231_v51, %v227_v50 }
  0xa0   :  { %v240_v11 = vsel %vm80_vm9, %v232_v52, 0.0 }
  0xa1   :  { %v250_v9 = vsel %vm62_vm0, %v240_v11, 0.0  ;;  %v267_v60 = vadd.f32 %v246_v53, %v245_v1 }
  0xa2   :  { %v251_v12 = vadd.f32 %v250_v9, %v249_v16 }
  0xa3   :  { %v268_v36 = vadd.f32 %v267_v60, %v247_v13 }
  0xa4   :  { %v255_v59 = vadd.f32 %v251_v12, %v244_v2 }
  0xa6   :  { %259 = vst.msk [vmem:[#allocation2 + $0x18] sm:$0xff] %vm62_vm0, %v255_v59 }
  0xad   :  { %v266_v61 = vld [vmem:[#allocation2 + $0x18] sm:$0xff] }
  0xae   :  { %v269_v62 = vsel %vm62_vm0, %v266_v61, 0.0 }
  0xaf   :  { %v270_v3 = vadd.f32 %v269_v62, %v268_v36 }
  0xb1   :  { %271 = vadd.xlane.f32.xlu1 %v270_v3 }
 0x13e   :  { %v272_v7 = vpop.xlane.xlu1 %271 }
 0x13f   :  { %v273_v54 = vrot.slane %v272_v7, 4 }
 0x141   :  { %v274_v14 = vadd.f32 %v273_v54, %v272_v7 }
 0x143   :  { %v275_v37 = vrot.slane %v274_v14, 2 }
 0x145   :  { %v276_v15 = vadd.f32 %v275_v37, %v274_v14 }
 0x147   :  { %v277_v17 = vrot.slane %v276_v15, 1 }
 0x149   :  { %v278_v38 = vadd.f32 %v277_v17, %v276_v15 }
 0x14b   :  { %302 = vpush %v278_v38 }
 0x17c   :  { %s303_s0 = spop %302 }
 0x17d   :  { %281 = sst [smem:[#allocation6]] %s303_s0 }
 0x17e   :  { %374 = shalt.err (!%p371_p10)
}
 0x17f   :  { %s384_s5 = smov [#allocation6]  }
 0x180   :  { %289 = dma.smem_to_hbm %s384_s5, 16, %s619_s2, [#allocation5]  }
 0x181   :  { %377 = dma.done.wait [#allocation5], 16  }
 0x182   :  { %378 = vsyncadd [#allocation5], 4294967280 }
 0x183   :  { %293 = sfence }
 0x184   :  { %294 = vsyncpa [#allocation4], 1 }
 0x185   :  { %295 = vsyncpa [#allocation5], 1 }

</bundles_post_ra>
